<compile_context>
chip_gen: v5e
topology: v5e:2x2
jax: 0.10.0
libtpu: 0.0.40
codegen_flags: <defaults>
</compile_context>

<pallas_src>
import jax
import jax.numpy as jnp
from jax.experimental import pallas as pl
from jax.experimental.pallas import tpu as pltpu


def conv1x1_kernel(x_ref, w_ref, o_ref):
    # x_ref: (B, C_in,  P, L) f32 in VMEM  (P x L = pixel slab, lane-dense)
    # w_ref: (C_out*C_in,)    f32 in SMEM  (scalar-indexed)
    # o_ref: (B, C_out, P, L) f32 in VMEM
    nb, cin = x_ref.shape[0], x_ref.shape[1]
    cout = o_ref.shape[1]
    for b in range(nb):                         # B is tiny: trace-time unroll
        xs = [x_ref[b, i] for i in range(cin)]  # (P, L) slabs, loaded once per b
        for o in range(cout):
            # y[b, o] = sum_i w[o, i] * x[b, i] — SMEM scalar * VMEM slab FMAs (VPU).
            acc = w_ref[o * cin + 0] * xs[0]
            for i in range(1, cin):
                acc = acc + w_ref[o * cin + i] * xs[i]
            o_ref[b, o] = acc


def toy_model1_forward(x, weight):
    """1x1 conv, bias=False.

    x:      (B, C_in, H, W) float32 (NCHW, matching PyTorch)
    weight: (C_out, C_in, 1, 1) float32 (PyTorch Conv2d weight layout)
    returns (B, C_out, H, W) float32
    """
    B, CIN, H, W = x.shape
    COUT = weight.shape[0]
    HW = H * W

    # Free (contiguous) reshapes only — no transposes around the Pallas call.
    if HW % 128 == 0:
        P, L = HW // 128, 128        # lane-dense, multi-sublane pixel slabs
    else:
        P, L = 1, HW                 # fallback layout (still correct)
    x4d = x.reshape(B, CIN, P, L)
    w1d = weight.reshape(COUT * CIN)  # 1-D SMEM: ~64 B padded instead of 4 KiB

    vmem = pltpu.MemorySpace.VMEM
    smem = pltpu.MemorySpace.SMEM
    out_shape = jax.ShapeDtypeStruct((B, COUT, P, L), x.dtype)

    # Pixel-axis tiling only when the problem is large enough that the whole
    # array would stress VMEM (earliest on v7x, 64 MiB).  Never triggers at
    # toy shapes, where per-step grid overhead would dominate.
    TP = 0
    if L == 128 and P >= 1024:
        for cand in (1024, 512, 256, 128, 64, 32, 16, 8):
            if P % cand == 0:
                TP = cand
                break

    if TP:
        y4d = pl.pallas_call(
            conv1x1_kernel,
            out_shape=out_shape,
            grid=(P // TP,),
            in_specs=[
                pl.BlockSpec((B, CIN, TP, 128), lambda p: (0, 0, p, 0),
                             memory_space=vmem),
                pl.BlockSpec(memory_space=smem),
            ],
            out_specs=pl.BlockSpec((B, COUT, TP, 128), lambda p: (0, 0, p, 0),
                                   memory_space=vmem),
            compiler_params=pltpu.CompilerParams(
                dimension_semantics=("parallel",)),
        )(x4d, w1d)
    else:
        # Whole-array, single invocation: no pipeline bookkeeping for a few-KB
        # problem.
        y4d = pl.pallas_call(
            conv1x1_kernel,
            out_shape=out_shape,
            in_specs=[
                pl.BlockSpec(memory_space=vmem),   # activations
                pl.BlockSpec(memory_space=smem),   # 3x3 weight scalars
            ],
            out_specs=pl.BlockSpec(memory_space=vmem),
        )(x4d, w1d)

    # (B, C_out, P, L) -> (B, C_out, H, W): free reshape, no transpose.
    return y4d.reshape(B, COUT, H, W)


if __name__ == "__main__":
    key = jax.random.PRNGKey(0)
    k_x, k_w = jax.random.split(key, 2)

    B, CIN, COUT, H, W = 2, 3, 3, 16, 16

    # Deterministic init mimicking torch.nn.Conv2d's uniform range
    # (fan_in = CIN * kH * kW = 3).
    bound = 1.0 / (CIN ** 0.5)
    weight = jax.random.uniform(k_w, (COUT, CIN, 1, 1), jnp.float32, -bound, bound)
    x = jax.random.normal(k_x, (B, CIN, H, W), jnp.float32)

    out = toy_model1_forward(x, weight)
    out = jax.block_until_ready(out)

    # Sanity check against a plain-JAX reference of the 1x1 conv.
    ref = jnp.einsum("oi,bihw->bohw", weight.reshape(COUT, CIN), x)
    assert out.shape == (B, COUT, H, W)
    assert jnp.allclose(out, ref, atol=1e-5, rtol=1e-5)

    print("KERNEL_OK")
</pallas_src>

<mosaic_0001>
module attributes {stable_mosaic.version = 11 : i64} {
  func.func @conv1x1_kernel(%arg0: memref<2x3x2x128xf32, #tpu.memory_space<vmem>>, %arg1: memref<9xf32, #tpu.memory_space<smem>>, %arg2: memref<2x3x2x128xf32, #tpu.memory_space<vmem>>) attributes {dimension_semantics = [], scalar_prefetch = 0 : i64, scratch_operands = 0 : i64, tpu.core_type = #tpu.core_type<tc>} {
    %c0 = arith.constant 0 : index
    %c0_0 = arith.constant 0 : index
    %c0_1 = arith.constant 0 : index
    %c0_2 = arith.constant 0 : index
    %0 = vector.load %arg0[%c0, %c0_0, %c0_1, %c0_2] : memref<2x3x2x128xf32, #tpu.memory_space<vmem>>, vector<1x1x2x128xf32>
    %1 = vector.shape_cast %0 : vector<1x1x2x128xf32> to vector<2x128xf32>
    %c0_3 = arith.constant 0 : index
    %c1 = arith.constant 1 : index
    %c0_4 = arith.constant 0 : index
    %c0_5 = arith.constant 0 : index
    %2 = vector.load %arg0[%c0_3, %c1, %c0_4, %c0_5] : memref<2x3x2x128xf32, #tpu.memory_space<vmem>>, vector<1x1x2x128xf32>
    %3 = vector.shape_cast %2 : vector<1x1x2x128xf32> to vector<2x128xf32>
    %c0_6 = arith.constant 0 : index
    %c2 = arith.constant 2 : index
    %c0_7 = arith.constant 0 : index
    %c0_8 = arith.constant 0 : index
    %4 = vector.load %arg0[%c0_6, %c2, %c0_7, %c0_8] : memref<2x3x2x128xf32, #tpu.memory_space<vmem>>, vector<1x1x2x128xf32>
    %5 = vector.shape_cast %4 : vector<1x1x2x128xf32> to vector<2x128xf32>
    %c0_9 = arith.constant 0 : index
    %6 = memref.load %arg1[%c0_9] : memref<9xf32, #tpu.memory_space<smem>>
    %7 = vector.broadcast %6 : f32 to vector<2x128xf32>
    %8 = arith.mulf %7, %1 : vector<2x128xf32>
    %c1_10 = arith.constant 1 : index
    %9 = memref.load %arg1[%c1_10] : memref<9xf32, #tpu.memory_space<smem>>
    %10 = vector.broadcast %9 : f32 to vector<2x128xf32>
    %11 = arith.mulf %10, %3 : vector<2x128xf32>
    %12 = arith.addf %8, %11 : vector<2x128xf32>
    %c2_11 = arith.constant 2 : index
    %13 = memref.load %arg1[%c2_11] : memref<9xf32, #tpu.memory_space<smem>>
    %14 = vector.broadcast %13 : f32 to vector<2x128xf32>
    %15 = arith.mulf %14, %5 : vector<2x128xf32>
    %16 = arith.addf %12, %15 : vector<2x128xf32>
    %c0_12 = arith.constant 0 : index
    %c0_13 = arith.constant 0 : index
    %c0_14 = arith.constant 0 : index
    %c0_15 = arith.constant 0 : index
    %17 = vector.load %arg2[%c0_12, %c0_13, %c0_14, %c0_15] : memref<2x3x2x128xf32, #tpu.memory_space<vmem>>, vector<1x1x2x128xf32>
    %18 = vector.shape_cast %17 : vector<1x1x2x128xf32> to vector<2x128xf32>
    %19 = vector.shape_cast %16 : vector<2x128xf32> to vector<1x1x2x128xf32>
    tpu.vector_store %arg2[%c0_12, %c0_13, %c0_14, %c0_15], %19 {strides = array<i32>} : memref<2x3x2x128xf32, #tpu.memory_space<vmem>>, vector<1x1x2x128xf32>,
    %c3 = arith.constant 3 : index
    %20 = memref.load %arg1[%c3] : memref<9xf32, #tpu.memory_space<smem>>
    %21 = vector.broadcast %20 : f32 to vector<2x128xf32>
    %22 = arith.mulf %21, %1 : vector<2x128xf32>
    %c4 = arith.constant 4 : index
    %23 = memref.load %arg1[%c4] : memref<9xf32, #tpu.memory_space<smem>>
    %24 = vector.broadcast %23 : f32 to vector<2x128xf32>
    %25 = arith.mulf %24, %3 : vector<2x128xf32>
    %26 = arith.addf %22, %25 : vector<2x128xf32>
    %c5 = arith.constant 5 : index
    %27 = memref.load %arg1[%c5] : memref<9xf32, #tpu.memory_space<smem>>
    %28 = vector.broadcast %27 : f32 to vector<2x128xf32>
    %29 = arith.mulf %28, %5 : vector<2x128xf32>
    %30 = arith.addf %26, %29 : vector<2x128xf32>
    %c0_16 = arith.constant 0 : index
    %c1_17 = arith.constant 1 : index
    %c0_18 = arith.constant 0 : index
    %c0_19 = arith.constant 0 : index
    %31 = vector.load %arg2[%c0_16, %c1_17, %c0_18, %c0_19] : memref<2x3x2x128xf32, #tpu.memory_space<vmem>>, vector<1x1x2x128xf32>
    %32 = vector.shape_cast %31 : vector<1x1x2x128xf32> to vector<2x128xf32>
    %33 = vector.shape_cast %30 : vector<2x128xf32> to vector<1x1x2x128xf32>
    tpu.vector_store %arg2[%c0_16, %c1_17, %c0_18, %c0_19], %33 {strides = array<i32>} : memref<2x3x2x128xf32, #tpu.memory_space<vmem>>, vector<1x1x2x128xf32>,
    %c6 = arith.constant 6 : index
    %34 = memref.load %arg1[%c6] : memref<9xf32, #tpu.memory_space<smem>>
    %35 = vector.broadcast %34 : f32 to vector<2x128xf32>
    %36 = arith.mulf %35, %1 : vector<2x128xf32>
    %c7 = arith.constant 7 : index
    %37 = memref.load %arg1[%c7] : memref<9xf32, #tpu.memory_space<smem>>
    %38 = vector.broadcast %37 : f32 to vector<2x128xf32>
    %39 = arith.mulf %38, %3 : vector<2x128xf32>
    %40 = arith.addf %36, %39 : vector<2x128xf32>
    %c8 = arith.constant 8 : index
    %41 = memref.load %arg1[%c8] : memref<9xf32, #tpu.memory_space<smem>>
    %42 = vector.broadcast %41 : f32 to vector<2x128xf32>
    %43 = arith.mulf %42, %5 : vector<2x128xf32>
    %44 = arith.addf %40, %43 : vector<2x128xf32>
    %c0_20 = arith.constant 0 : index
    %c2_21 = arith.constant 2 : index
    %c0_22 = arith.constant 0 : index
    %c0_23 = arith.constant 0 : index
    %45 = vector.load %arg2[%c0_20, %c2_21, %c0_22, %c0_23] : memref<2x3x2x128xf32, #tpu.memory_space<vmem>>, vector<1x1x2x128xf32>
    %46 = vector.shape_cast %45 : vector<1x1x2x128xf32> to vector<2x128xf32>
    %47 = vector.shape_cast %44 : vector<2x128xf32> to vector<1x1x2x128xf32>
    tpu.vector_store %arg2[%c0_20, %c2_21, %c0_22, %c0_23], %47 {strides = array<i32>} : memref<2x3x2x128xf32, #tpu.memory_space<vmem>>, vector<1x1x2x128xf32>,
    %c1_24 = arith.constant 1 : index
    %c0_25 = arith.constant 0 : index
    %c0_26 = arith.constant 0 : index
    %c0_27 = arith.constant 0 : index
    %48 = vector.load %arg0[%c1_24, %c0_25, %c0_26, %c0_27] : memref<2x3x2x128xf32, #tpu.memory_space<vmem>>, vector<1x1x2x128xf32>
    %49 = vector.shape_cast %48 : vector<1x1x2x128xf32> to vector<2x128xf32>
    %c1_28 = arith.constant 1 : index
    %c1_29 = arith.constant 1 : index
    %c0_30 = arith.constant 0 : index
    %c0_31 = arith.constant 0 : index
    %50 = vector.load %arg0[%c1_28, %c1_29, %c0_30, %c0_31] : memref<2x3x2x128xf32, #tpu.memory_space<vmem>>, vector<1x1x2x128xf32>
    %51 = vector.shape_cast %50 : vector<1x1x2x128xf32> to vector<2x128xf32>
    %c1_32 = arith.constant 1 : index
    %c2_33 = arith.constant 2 : index
    %c0_34 = arith.constant 0 : index
    %c0_35 = arith.constant 0 : index
    %52 = vector.load %arg0[%c1_32, %c2_33, %c0_34, %c0_35] : memref<2x3x2x128xf32, #tpu.memory_space<vmem>>, vector<1x1x2x128xf32>
    %53 = vector.shape_cast %52 : vector<1x1x2x128xf32> to vector<2x128xf32>
    %c0_36 = arith.constant 0 : index
    %54 = memref.load %arg1[%c0_36] : memref<9xf32, #tpu.memory_space<smem>>
    %55 = vector.broadcast %54 : f32 to vector<2x128xf32>
    %56 = arith.mulf %55, %49 : vector<2x128xf32>
    %c1_37 = arith.constant 1 : index
    %57 = memref.load %arg1[%c1_37] : memref<9xf32, #tpu.memory_space<smem>>
    %58 = vector.broadcast %57 : f32 to vector<2x128xf32>
    %59 = arith.mulf %58, %51 : vector<2x128xf32>
    %60 = arith.addf %56, %59 : vector<2x128xf32>
    %c2_38 = arith.constant 2 : index
    %61 = memref.load %arg1[%c2_38] : memref<9xf32, #tpu.memory_space<smem>>
    %62 = vector.broadcast %61 : f32 to vector<2x128xf32>
    %63 = arith.mulf %62, %53 : vector<2x128xf32>
    %64 = arith.addf %60, %63 : vector<2x128xf32>
    %c1_39 = arith.constant 1 : index
    %c0_40 = arith.constant 0 : index
    %c0_41 = arith.constant 0 : index
    %c0_42 = arith.constant 0 : index
    %65 = vector.load %arg2[%c1_39, %c0_40, %c0_41, %c0_42] : memref<2x3x2x128xf32, #tpu.memory_space<vmem>>, vector<1x1x2x128xf32>
    %66 = vector.shape_cast %65 : vector<1x1x2x128xf32> to vector<2x128xf32>
    %67 = vector.shape_cast %64 : vector<2x128xf32> to vector<1x1x2x128xf32>
    tpu.vector_store %arg2[%c1_39, %c0_40, %c0_41, %c0_42], %67 {strides = array<i32>} : memref<2x3x2x128xf32, #tpu.memory_space<vmem>>, vector<1x1x2x128xf32>,
    %c3_43 = arith.constant 3 : index
    %68 = memref.load %arg1[%c3_43] : memref<9xf32, #tpu.memory_space<smem>>
    %69 = vector.broadcast %68 : f32 to vector<2x128xf32>
    %70 = arith.mulf %69, %49 : vector<2x128xf32>
    %c4_44 = arith.constant 4 : index
    %71 = memref.load %arg1[%c4_44] : memref<9xf32, #tpu.memory_space<smem>>
    %72 = vector.broadcast %71 : f32 to vector<2x128xf32>
    %73 = arith.mulf %72, %51 : vector<2x128xf32>
    %74 = arith.addf %70, %73 : vector<2x128xf32>
    %c5_45 = arith.constant 5 : index
    %75 = memref.load %arg1[%c5_45] : memref<9xf32, #tpu.memory_space<smem>>
    %76 = vector.broadcast %75 : f32 to vector<2x128xf32>
    %77 = arith.mulf %76, %53 : vector<2x128xf32>
    %78 = arith.addf %74, %77 : vector<2x128xf32>
    %c1_46 = arith.constant 1 : index
    %c1_47 = arith.constant 1 : index
    %c0_48 = arith.constant 0 : index
    %c0_49 = arith.constant 0 : index
    %79 = vector.load %arg2[%c1_46, %c1_47, %c0_48, %c0_49] : memref<2x3x2x128xf32, #tpu.memory_space<vmem>>, vector<1x1x2x128xf32>
    %80 = vector.shape_cast %79 : vector<1x1x2x128xf32> to vector<2x128xf32>
    %81 = vector.shape_cast %78 : vector<2x128xf32> to vector<1x1x2x128xf32>
    tpu.vector_store %arg2[%c1_46, %c1_47, %c0_48, %c0_49], %81 {strides = array<i32>} : memref<2x3x2x128xf32, #tpu.memory_space<vmem>>, vector<1x1x2x128xf32>,
    %c6_50 = arith.constant 6 : index
    %82 = memref.load %arg1[%c6_50] : memref<9xf32, #tpu.memory_space<smem>>
    %83 = vector.broadcast %82 : f32 to vector<2x128xf32>
    %84 = arith.mulf %83, %49 : vector<2x128xf32>
    %c7_51 = arith.constant 7 : index
    %85 = memref.load %arg1[%c7_51] : memref<9xf32, #tpu.memory_space<smem>>
    %86 = vector.broadcast %85 : f32 to vector<2x128xf32>
    %87 = arith.mulf %86, %51 : vector<2x128xf32>
    %88 = arith.addf %84, %87 : vector<2x128xf32>
    %c8_52 = arith.constant 8 : index
    %89 = memref.load %arg1[%c8_52] : memref<9xf32, #tpu.memory_space<smem>>
    %90 = vector.broadcast %89 : f32 to vector<2x128xf32>
    %91 = arith.mulf %90, %53 : vector<2x128xf32>
    %92 = arith.addf %88, %91 : vector<2x128xf32>
    %c1_53 = arith.constant 1 : index
    %c2_54 = arith.constant 2 : index
    %c0_55 = arith.constant 0 : index
    %c0_56 = arith.constant 0 : index
    %93 = vector.load %arg2[%c1_53, %c2_54, %c0_55, %c0_56] : memref<2x3x2x128xf32, #tpu.memory_space<vmem>>, vector<1x1x2x128xf32>
    %94 = vector.shape_cast %93 : vector<1x1x2x128xf32> to vector<2x128xf32>
    %95 = vector.shape_cast %92 : vector<2x128xf32> to vector<1x1x2x128xf32>
    tpu.vector_store %arg2[%c1_53, %c2_54, %c0_55, %c0_56], %95 {strides = array<i32>} : memref<2x3x2x128xf32, #tpu.memory_space<vmem>>, vector<1x1x2x128xf32>,
    return
  }
}

</mosaic_0001>

<bundles_post_ra>
// kernel: tpu_custom_call.1
= control target key start
LH: loop header
LB: loop body
LE: loop exit
PB: predicated region body
PF: predicated region fallthrough
CT: control target
= control target key end

     0   :  { %7 = vsyncpa [#allocation3], 0  ;;  %s280_s0 = inlined_call_operand.hbm [shape: f32[2,3,2,128], index: 0, kind: input, shape index: {}]   ;;  %s281_s1 = inlined_call_operand.hbm [shape: f32[9], index: 1, kind: input, shape index: {}]   ;;  %s282_s2 = inlined_call_operand.hbm [shape: f32[2,3,2,128], index: 2, kind: output, shape index: {}]  }
   0x1   :  { %8 = vsyncpa [#allocation5], 0 }
   0x2   :  { %9 = vsyncpa [#allocation4], 0  ;;  %s14_s11 = sshll.u32 %s280_s0, 4  ;;  %s236_s12 = smov [#allocation2]   ;;  %s15_s11 = int_to_ptr.hbm [resolvable:$true] %s14_s11 }
   0x3   :  { %s16_s13 = sshll.u32 %s236_s12, 4  ;;  %s28_s16 = sshll.u32 %s281_s1, 4  ;;  %s17_s13 = int_to_ptr.vmem [resolvable:$true] %s16_s13  ;;  %s29_s16 = int_to_ptr.hbm [resolvable:$true] %s28_s16 }
   0x4   :  { %s237_s17 = smov 32   ;;  %s238_s18 = smov 2  }
   0x5   :  { %22 = dma.hbm_to_vmem [thread:$0]  %s15_s11, 192, %s17_s13, [#allocation3], %s237_s17, %s237_s17, %s238_s18  }
   0x6   :  { %s239_s19 = smov [#allocation6]  }
   0x7   :  { %31 = dma.hbm_to_smem %s29_s16, 16, %s239_s19, [#allocation5]  }
   0x8   :  { %230 = dma.done.wait [#allocation3], 192  }
   0x9   :  { %231 = vsyncadd [#allocation3], 4294967104 }
   0xa   :  { %232 = dma.done.wait [#allocation5], 16  }
   0xb   :  { %233 = vsyncadd [#allocation5], 4294967280 }
   0xc   :  { %40 = sfence }
   0xd   :  { %s46_s0 = sld [smem:[#allocation6]]  ;;  %v41_v0 = vld [vmem:[#allocation2] sm:$0x3]  ;;  %v85_v1 = vld [vmem:[#allocation2 + $0x6] sm:$0x3]  ;;  %s240_s27 = smov [#allocation7]  }
   0xe   :  { %s149_s20 = sld [smem:[#allocation6 + $0x1]]  ;;  %v43_v2 = vld [vmem:[#allocation2 + $0x2] sm:$0x3]  ;;  %v87_v3 = vld [vmem:[#allocation2 + $0x8] sm:$0x3]  ;;  %s133_s28 = sshll.u32 %s240_s27, 4  ;;  %s134_s28 = int_to_ptr.vmem [resolvable:$true] %s133_s28 }
   0xf   :  { %s150_s21 = sld [smem:[#allocation6 + $0x2]]  ;;  %v45_v4 = vld [vmem:[#allocation2 + $0x4] sm:$0x3]  ;;  %v89_v6 = vld [vmem:[#allocation2 + $0xa] sm:$0x3]  ;;  %s135_s3 = sshll.u32 %s282_s2, 4  ;;  %s136_s3 = int_to_ptr.hbm [resolvable:$true] %s135_s3 }
  0x10   :  { %s151_s22 = sld [smem:[#allocation6 + $0x3]] }
  0x11   :  { %s152_s1 = sld [smem:[#allocation6 + $0x4]] }
  0x12   :  { %s265_s23 = sld [smem:[#allocation6 + $0x5]] }
  0x13   :  { %v47_v5 = vstv %s46_s0  ;;  %s267_s24 = sld [smem:[#allocation6 + $0x6]] }
  0x14   :  { %v48_v7 = vmul.f32 %v47_v5, %v41_v0  ;;  %v50_v8 = vstv %s149_s20  ;;  %s269_s25 = sld [smem:[#allocation6 + $0x7]]  ;;  %v92_v9 = vmul.f32 %v85_v1, %v47_v5 }
  0x15   :  { %v51_v10 = vmul.f32 %v50_v8, %v43_v2  ;;  %v54_v11 = vstv %s150_s21  ;;  %s156_s26 = sld [smem:[#allocation6 + $0x8]]  ;;  %v95_v12 = vmul.f32 %v87_v3, %v50_v8 }
  0x16   :  { %v55_v13 = vmul.f32 %v54_v11, %v45_v4  ;;  %v59_v14 = vstv %s151_s22  ;;  %v99_v15 = vmul.f32 %v89_v6, %v54_v11 }
  0x17   :  { %v52_v16 = vadd.f32 %v51_v10, %v48_v7  ;;  %v60_v17 = vmul.f32 %v59_v14, %v41_v0  ;;  %v62_v18 = vstv %s152_s1  ;;  %v96_v19 = vadd.f32 %v95_v12, %v92_v9 }
  0x18   :  { %v63_v20 = vmul.f32 %v62_v18, %v43_v2  ;;  %v66_v21 = vstv %s265_s23  ;;  %v105_v22 = vmul.f32 %v85_v1, %v59_v14  ;;  %v108_v23 = vmul.f32 %v87_v3, %v62_v18 }
  0x19   :  { %v56_v24 = vadd.f32 %v55_v13, %v52_v16  ;;  %v67_v25 = vmul.f32 %v66_v21, %v45_v4  ;;  %v72_v26 = vstv %s267_s24  ;;  %v100_v27 = vadd.f32 %v99_v15, %v96_v19 }
  0x1a   :  { %v64_v28 = vadd.f32 %v63_v20, %v60_v17  ;;  %v73_v29 = vmul.f32 %v72_v26, %v41_v0  ;;  %v75_v30 = vstv %s269_s25  ;;  %v109_v31 = vadd.f32 %v108_v23, %v105_v22 }
  0x1b   :  { %57 = vst [vmem:[#allocation7] sm:$0x3] %v56_v24  ;;  %v76_v32 = vmul.f32 %v75_v30, %v43_v2  ;;  %v79_v33 = vstv %s156_s26  ;;  %v112_v34 = vmul.f32 %v89_v6, %v66_v21  ;;  %v118_v35 = vmul.f32 %v85_v1, %v72_v26 }
  0x1c   :  { %v68_v36 = vadd.f32 %v67_v25, %v64_v28  ;;  %v80_v37 = vmul.f32 %v79_v33, %v45_v4  ;;  %102 = vst [vmem:[#allocation7 + $0x6] sm:$0x3] %v100_v27  ;;  %v121_v38 = vmul.f32 %v87_v3, %v75_v30  ;;  %v125_v39 = vmul.f32 %v89_v6, %v79_v33 }
  0x1d   :  { %v77_v40 = vadd.f32 %v76_v32, %v73_v29  ;;  %v113_v41 = vadd.f32 %v112_v34, %v109_v31 }
  0x1e   :  { %70 = vst [vmem:[#allocation7 + $0x2] sm:$0x3] %v68_v36  ;;  %v122_v42 = vadd.f32 %v121_v38, %v118_v35 }
  0x1f   :  { %v81_v43 = vadd.f32 %v80_v37, %v77_v40  ;;  %115 = vst [vmem:[#allocation7 + $0x8] sm:$0x3] %v113_v41 }
  0x20   :  { %v126_v44 = vadd.f32 %v125_v39, %v122_v42 }
  0x21   :  { %83 = vst [vmem:[#allocation7 + $0x4] sm:$0x3] %v81_v43 }
  0x22   :  { %128 = vst [vmem:[#allocation7 + $0xa] sm:$0x3] %v126_v44 }
  0x23   :  { %141 = dma.vmem_to_hbm [thread:$0]  %s134_s28, 192, %s136_s3, [#allocation4], %s237_s17, %s237_s17, %s238_s18  }
  0x24   :  { %234 = dma.done.wait [#allocation4], 192  }
  0x25   :  { %235 = vsyncadd [#allocation4], 4294967104 }
  0x26   :  { %146 = vsyncpa [#allocation3], 1 }
  0x27   :  { %147 = vsyncpa [#allocation4], 1 }
  0x28   :  { %148 = vsyncpa [#allocation5], 1 }

</bundles_post_ra>
